<compile_context>
chip_gen: v6e
topology: v6e:2x2x1
jax: 0.10.0
libtpu: 0.0.40
codegen_flags: <defaults>
</compile_context>

<pallas_src>
import functools
import math

import jax
import jax.numpy as jnp
import numpy as np
from jax.experimental import pallas as pl
from jax.experimental.pallas import tpu as pltpu


# --------------------------- Pallas kernel ----------------------------------
def scene_prob_kernel(x_ref, w1_ref, b1_ref, w2_ref, b2_ref, o_ref):
    """Fused SceneProbability MLP on one batch tile.

      x_ref  : (2, TR, 128) f32 VMEM   row 0 = vis_y, row 1 = delta
      w1_ref : (2H,) f32 SMEM          Linear(2,H).weight, row-major flat
      b1_ref : (H,)  f32 SMEM          Linear(2,H).bias
      w2_ref : (H,)  f32 SMEM          Linear(H,1).weight
      b2_ref : (1,)  f32 SMEM          Linear(H,1).bias
      o_ref  : (TR, 128) f32 VMEM      sigmoid output tile
    """
    vy = x_ref[0]                       # (TR, 128)
    dl = x_ref[1]                       # (TR, 128)
    H = b1_ref.shape[0]

    # Per-hidden scalar accumulate: all work on full (8,128) vregs, no
    # (H, batch) intermediate, no cross-sublane reduction.
    def hidden_term(j):
        h = vy * w1_ref[2 * j] + dl * w1_ref[2 * j + 1] + b1_ref[j]
        return jnp.maximum(h, 0.0) * w2_ref[j]

    acc = hidden_term(0)
    for j in range(1, H):               # H is static -> fully unrolled
        acc = acc + hidden_term(j)
    z = acc + b2_ref[0]

    # Sigmoid: exp runs on the EUP; exact divide is once per output vreg.
    o_ref[...] = 1.0 / (1.0 + jnp.exp(-z))


# ------------------------------ wrapper --------------------------------------
@functools.partial(jax.jit, static_argnames=("block_rows",))
def scene_probability_forward(vis_y, delta, w1, b1, w2, b2, *, block_rows=64):
    """vis_y, delta: (B, 1) f32.  w1: (H, 2), b1: (H,), w2: (1, H), b2: (1,).

    Returns alpha: (B, 1, 1, 1) f32, matching the PyTorch forward.
    block_rows * 128 = batch elements processed per grid step (default 8192).
    """
    B = vis_y.shape[0]
    H = w1.shape[0]

    R = pl.cdiv(B, 128)                 # sublane rows when batch is laid (R, 128)
    Bp = R * 128

    # Choose the per-step sublane tile: full array when small, otherwise an
    # 8-aligned tile (partial last block handled by Pallas masked stores).
    tr = min(block_rows, R)
    if tr < R:
        tr = max(8, (tr // 8) * 8)
    tr = min(tr, R)
    grid = (pl.cdiv(R, tr),)

    # (B,1)->(B,) is free; stack + pad fuse into one small XLA copy producing
    # a single (2, R, 128) input slab (one DMA stream per grid step).
    packed = jnp.stack([vis_y.reshape(B), delta.reshape(B)], axis=0)   # (2, B)
    packed = jnp.pad(packed, ((0, 0), (0, Bp - B))).reshape(2, R, 128)

    w1f = w1.reshape(2 * H)             # row-major: [w[0,0], w[0,1], w[1,0], ...]
    w2f = w2.reshape(H)                 # (1,H) -> (H,) keeps element order

    cost = pl.CostEstimate(
        flops=int(Bp * (7 * H + 4)),
        transcendentals=int(Bp),
        bytes_accessed=int(4 * (3 * Bp + 3 * H + 1)),
    )

    out = pl.pallas_call(
        scene_prob_kernel,
        out_shape=jax.ShapeDtypeStruct((R, 128), jnp.float32),
        grid_spec=pltpu.PrefetchScalarGridSpec(
            num_scalar_prefetch=0,
            grid=grid,
            in_specs=[
                pl.BlockSpec((2, tr, 128), lambda i: (0, i, 0)),      # vis_y+delta
                pl.BlockSpec(memory_space=pltpu.MemorySpace.SMEM),    # w1 (2H,)
                pl.BlockSpec(memory_space=pltpu.MemorySpace.SMEM),    # b1 (H,)
                pl.BlockSpec(memory_space=pltpu.MemorySpace.SMEM),    # w2 (H,)
                pl.BlockSpec(memory_space=pltpu.MemorySpace.SMEM),    # b2 (1,)
            ],
            out_specs=pl.BlockSpec((tr, 128), lambda i: (i, 0)),
        ),
        compiler_params=pltpu.CompilerParams(
            dimension_semantics=("parallel",)),
        cost_estimate=cost,
    )(packed, w1f, b1, w2f, b2)

    # (R,128) -> (Bp,) -> drop padding (no-op when B % 128 == 0) -> (B,1,1,1).
    return out.reshape(Bp)[:B].reshape(B, 1, 1, 1)


# ------------------------- reference (plain JAX) ------------------------------
def scene_probability_reference(vis_y, delta, w1, b1, w2, b2):
    v = jnp.stack([vis_y.squeeze(1), delta.squeeze(1)], axis=1)   # (B, 2)
    h = jnp.maximum(v @ w1.T + b1, 0.0)                           # (B, H)
    z = h @ w2.T + b2                                             # (B, 1)
    alpha = jax.nn.sigmoid(z)
    return alpha[:, :, None, None]                                # (B, 1, 1, 1)


# --------------------------------- main ---------------------------------------
if __name__ == "__main__":
    hidden = 16

    key = jax.random.PRNGKey(0)
    k1, k2, k3, k4, k5, k6 = jax.random.split(key, 6)

    # nn.Linear default init: uniform(-1/sqrt(fan_in), 1/sqrt(fan_in)).
    bound1 = 1.0 / math.sqrt(2.0)
    w1 = jax.random.uniform(k3, (hidden, 2), jnp.float32, -bound1, bound1)
    b1 = jax.random.uniform(k4, (hidden,), jnp.float32, -bound1, bound1)
    bound2 = 1.0 / math.sqrt(float(hidden))
    w2 = jax.random.uniform(k5, (1, hidden), jnp.float32, -bound2, bound2)
    b2 = jax.random.uniform(k6, (1,), jnp.float32, -bound2, bound2)

    # Primary small case (B=2) plus two cases exercising padding and the
    # multi-step / partial-block path.
    for B, block_rows in [(2, 64), (300, 64), (1500, 8)]:
        kb = jax.random.fold_in(k1, B)
        kb1, kb2 = jax.random.split(kb)
        vis_y = jax.random.normal(kb1, (B, 1), dtype=jnp.float32)
        delta = jax.random.normal(kb2, (B, 1), dtype=jnp.float32)

        alpha = jax.block_until_ready(
            scene_probability_forward(vis_y, delta, w1, b1, w2, b2,
                                      block_rows=block_rows))
        alpha_ref = jax.block_until_ready(
            scene_probability_reference(vis_y, delta, w1, b1, w2, b2))

        assert alpha.shape == (B, 1, 1, 1)
        np.testing.assert_allclose(np.asarray(alpha), np.asarray(alpha_ref),
                                   rtol=1e-5, atol=1e-6)

    print("KERNEL_OK")
</pallas_src>

<mosaic_0001>
module attributes {stable_mosaic.version = 11 : i64} {
  func.func @scene_prob_kernel(%arg0: i32, %arg1: memref<2x1x128xf32, #tpu.memory_space<vmem>>, %arg2: memref<32xf32, #tpu.memory_space<smem>>, %arg3: memref<16xf32, #tpu.memory_space<smem>>, %arg4: memref<16xf32, #tpu.memory_space<smem>>, %arg5: memref<1xf32, #tpu.memory_space<smem>>, %arg6: memref<1x128xf32, #tpu.memory_space<vmem>>) attributes {dimension_semantics = [#tpu.dimension_semantics<parallel>], iteration_bounds = array<i64: 1>, scalar_prefetch = 0 : i64, scratch_operands = 0 : i64, tpu.core_type = #tpu.core_type<tc>, window_params = [{transform_indices = @transform_0, window_bounds = array<i64: 2, 1, 128>}, {transform_indices = @transform_1, window_bounds = array<i64: 32>}, {transform_indices = @transform_2, window_bounds = array<i64: 16>}, {transform_indices = @transform_3, window_bounds = array<i64: 16>}, {transform_indices = @transform_4, window_bounds = array<i64: 1>}, {transform_indices = @transform_5, window_bounds = array<i64: 1, 128>}]} {
    %c0 = arith.constant 0 : index
    %c0_0 = arith.constant 0 : index
    %c0_1 = arith.constant 0 : index
    %0 = vector.load %arg1[%c0, %c0_0, %c0_1] : memref<2x1x128xf32, #tpu.memory_space<vmem>>, vector<1x1x128xf32>
    %1 = vector.shape_cast %0 : vector<1x1x128xf32> to vector<1x128xf32>
    %c1 = arith.constant 1 : index
    %c0_2 = arith.constant 0 : index
    %c0_3 = arith.constant 0 : index
    %2 = vector.load %arg1[%c1, %c0_2, %c0_3] : memref<2x1x128xf32, #tpu.memory_space<vmem>>, vector<1x1x128xf32>
    %3 = vector.shape_cast %2 : vector<1x1x128xf32> to vector<1x128xf32>
    %c0_4 = arith.constant 0 : index
    %4 = memref.load %arg2[%c0_4] : memref<32xf32, #tpu.memory_space<smem>>
    %5 = vector.broadcast %4 : f32 to vector<1x128xf32>
    %6 = arith.mulf %1, %5 : vector<1x128xf32>
    %c1_5 = arith.constant 1 : index
    %7 = memref.load %arg2[%c1_5] : memref<32xf32, #tpu.memory_space<smem>>
    %8 = vector.broadcast %7 : f32 to vector<1x128xf32>
    %9 = arith.mulf %3, %8 : vector<1x128xf32>
    %10 = arith.addf %6, %9 : vector<1x128xf32>
    %c0_6 = arith.constant 0 : index
    %11 = memref.load %arg3[%c0_6] : memref<16xf32, #tpu.memory_space<smem>>
    %12 = vector.broadcast %11 : f32 to vector<1x128xf32>
    %13 = arith.addf %10, %12 : vector<1x128xf32>
    %cst = arith.constant 0.000000e+00 : f32
    %14 = vector.broadcast %cst : f32 to vector<1x128xf32>
    %15 = arith.maximumf %13, %14 : vector<1x128xf32>
    %c0_7 = arith.constant 0 : index
    %16 = memref.load %arg4[%c0_7] : memref<16xf32, #tpu.memory_space<smem>>
    %17 = vector.broadcast %16 : f32 to vector<1x128xf32>
    %18 = arith.mulf %15, %17 : vector<1x128xf32>
    %c2 = arith.constant 2 : index
    %19 = memref.load %arg2[%c2] : memref<32xf32, #tpu.memory_space<smem>>
    %20 = vector.broadcast %19 : f32 to vector<1x128xf32>
    %21 = arith.mulf %1, %20 : vector<1x128xf32>
    %c3 = arith.constant 3 : index
    %22 = memref.load %arg2[%c3] : memref<32xf32, #tpu.memory_space<smem>>
    %23 = vector.broadcast %22 : f32 to vector<1x128xf32>
    %24 = arith.mulf %3, %23 : vector<1x128xf32>
    %25 = arith.addf %21, %24 : vector<1x128xf32>
    %c1_8 = arith.constant 1 : index
    %26 = memref.load %arg3[%c1_8] : memref<16xf32, #tpu.memory_space<smem>>
    %27 = vector.broadcast %26 : f32 to vector<1x128xf32>
    %28 = arith.addf %25, %27 : vector<1x128xf32>
    %cst_9 = arith.constant 0.000000e+00 : f32
    %29 = vector.broadcast %cst_9 : f32 to vector<1x128xf32>
    %30 = arith.maximumf %28, %29 : vector<1x128xf32>
    %c1_10 = arith.constant 1 : index
    %31 = memref.load %arg4[%c1_10] : memref<16xf32, #tpu.memory_space<smem>>
    %32 = vector.broadcast %31 : f32 to vector<1x128xf32>
    %33 = arith.mulf %30, %32 : vector<1x128xf32>
    %34 = arith.addf %18, %33 : vector<1x128xf32>
    %c4 = arith.constant 4 : index
    %35 = memref.load %arg2[%c4] : memref<32xf32, #tpu.memory_space<smem>>
    %36 = vector.broadcast %35 : f32 to vector<1x128xf32>
    %37 = arith.mulf %1, %36 : vector<1x128xf32>
    %c5 = arith.constant 5 : index
    %38 = memref.load %arg2[%c5] : memref<32xf32, #tpu.memory_space<smem>>
    %39 = vector.broadcast %38 : f32 to vector<1x128xf32>
    %40 = arith.mulf %3, %39 : vector<1x128xf32>
    %41 = arith.addf %37, %40 : vector<1x128xf32>
    %c2_11 = arith.constant 2 : index
    %42 = memref.load %arg3[%c2_11] : memref<16xf32, #tpu.memory_space<smem>>
    %43 = vector.broadcast %42 : f32 to vector<1x128xf32>
    %44 = arith.addf %41, %43 : vector<1x128xf32>
    %cst_12 = arith.constant 0.000000e+00 : f32
    %45 = vector.broadcast %cst_12 : f32 to vector<1x128xf32>
    %46 = arith.maximumf %44, %45 : vector<1x128xf32>
    %c2_13 = arith.constant 2 : index
    %47 = memref.load %arg4[%c2_13] : memref<16xf32, #tpu.memory_space<smem>>
    %48 = vector.broadcast %47 : f32 to vector<1x128xf32>
    %49 = arith.mulf %46, %48 : vector<1x128xf32>
    %50 = arith.addf %34, %49 : vector<1x128xf32>
    %c6 = arith.constant 6 : index
    %51 = memref.load %arg2[%c6] : memref<32xf32, #tpu.memory_space<smem>>
    %52 = vector.broadcast %51 : f32 to vector<1x128xf32>
    %53 = arith.mulf %1, %52 : vector<1x128xf32>
    %c7 = arith.constant 7 : index
    %54 = memref.load %arg2[%c7] : memref<32xf32, #tpu.memory_space<smem>>
    %55 = vector.broadcast %54 : f32 to vector<1x128xf32>
    %56 = arith.mulf %3, %55 : vector<1x128xf32>
    %57 = arith.addf %53, %56 : vector<1x128xf32>
    %c3_14 = arith.constant 3 : index
    %58 = memref.load %arg3[%c3_14] : memref<16xf32, #tpu.memory_space<smem>>
    %59 = vector.broadcast %58 : f32 to vector<1x128xf32>
    %60 = arith.addf %57, %59 : vector<1x128xf32>
    %cst_15 = arith.constant 0.000000e+00 : f32
    %61 = vector.broadcast %cst_15 : f32 to vector<1x128xf32>
    %62 = arith.maximumf %60, %61 : vector<1x128xf32>
    %c3_16 = arith.constant 3 : index
    %63 = memref.load %arg4[%c3_16] : memref<16xf32, #tpu.memory_space<smem>>
    %64 = vector.broadcast %63 : f32 to vector<1x128xf32>
    %65 = arith.mulf %62, %64 : vector<1x128xf32>
    %66 = arith.addf %50, %65 : vector<1x128xf32>
    %c8 = arith.constant 8 : index
    %67 = memref.load %arg2[%c8] : memref<32xf32, #tpu.memory_space<smem>>
    %68 = vector.broadcast %67 : f32 to vector<1x128xf32>
    %69 = arith.mulf %1, %68 : vector<1x128xf32>
    %c9 = arith.constant 9 : index
    %70 = memref.load %arg2[%c9] : memref<32xf32, #tpu.memory_space<smem>>
    %71 = vector.broadcast %70 : f32 to vector<1x128xf32>
    %72 = arith.mulf %3, %71 : vector<1x128xf32>
    %73 = arith.addf %69, %72 : vector<1x128xf32>
    %c4_17 = arith.constant 4 : index
    %74 = memref.load %arg3[%c4_17] : memref<16xf32, #tpu.memory_space<smem>>
    %75 = vector.broadcast %74 : f32 to vector<1x128xf32>
    %76 = arith.addf %73, %75 : vector<1x128xf32>
    %cst_18 = arith.constant 0.000000e+00 : f32
    %77 = vector.broadcast %cst_18 : f32 to vector<1x128xf32>
    %78 = arith.maximumf %76, %77 : vector<1x128xf32>
    %c4_19 = arith.constant 4 : index
    %79 = memref.load %arg4[%c4_19] : memref<16xf32, #tpu.memory_space<smem>>
    %80 = vector.broadcast %79 : f32 to vector<1x128xf32>
    %81 = arith.mulf %78, %80 : vector<1x128xf32>
    %82 = arith.addf %66, %81 : vector<1x128xf32>
    %c10 = arith.constant 10 : index
    %83 = memref.load %arg2[%c10] : memref<32xf32, #tpu.memory_space<smem>>
    %84 = vector.broadcast %83 : f32 to vector<1x128xf32>
    %85 = arith.mulf %1, %84 : vector<1x128xf32>
    %c11 = arith.constant 11 : index
    %86 = memref.load %arg2[%c11] : memref<32xf32, #tpu.memory_space<smem>>
    %87 = vector.broadcast %86 : f32 to vector<1x128xf32>
    %88 = arith.mulf %3, %87 : vector<1x128xf32>
    %89 = arith.addf %85, %88 : vector<1x128xf32>
    %c5_20 = arith.constant 5 : index
    %90 = memref.load %arg3[%c5_20] : memref<16xf32, #tpu.memory_space<smem>>
    %91 = vector.broadcast %90 : f32 to vector<1x128xf32>
    %92 = arith.addf %89, %91 : vector<1x128xf32>
    %cst_21 = arith.constant 0.000000e+00 : f32
    %93 = vector.broadcast %cst_21 : f32 to vector<1x128xf32>
    %94 = arith.maximumf %92, %93 : vector<1x128xf32>
    %c5_22 = arith.constant 5 : index
    %95 = memref.load %arg4[%c5_22] : memref<16xf32, #tpu.memory_space<smem>>
    %96 = vector.broadcast %95 : f32 to vector<1x128xf32>
    %97 = arith.mulf %94, %96 : vector<1x128xf32>
    %98 = arith.addf %82, %97 : vector<1x128xf32>
    %c12 = arith.constant 12 : index
    %99 = memref.load %arg2[%c12] : memref<32xf32, #tpu.memory_space<smem>>
    %100 = vector.broadcast %99 : f32 to vector<1x128xf32>
    %101 = arith.mulf %1, %100 : vector<1x128xf32>
    %c13 = arith.constant 13 : index
    %102 = memref.load %arg2[%c13] : memref<32xf32, #tpu.memory_space<smem>>
    %103 = vector.broadcast %102 : f32 to vector<1x128xf32>
    %104 = arith.mulf %3, %103 : vector<1x128xf32>
    %105 = arith.addf %101, %104 : vector<1x128xf32>
    %c6_23 = arith.constant 6 : index
    %106 = memref.load %arg3[%c6_23] : memref<16xf32, #tpu.memory_space<smem>>
    %107 = vector.broadcast %106 : f32 to vector<1x128xf32>
    %108 = arith.addf %105, %107 : vector<1x128xf32>
    %cst_24 = arith.constant 0.000000e+00 : f32
    %109 = vector.broadcast %cst_24 : f32 to vector<1x128xf32>
    %110 = arith.maximumf %108, %109 : vector<1x128xf32>
    %c6_25 = arith.constant 6 : index
    %111 = memref.load %arg4[%c6_25] : memref<16xf32, #tpu.memory_space<smem>>
    %112 = vector.broadcast %111 : f32 to vector<1x128xf32>
    %113 = arith.mulf %110, %112 : vector<1x128xf32>
    %114 = arith.addf %98, %113 : vector<1x128xf32>
    %c14 = arith.constant 14 : index
    %115 = memref.load %arg2[%c14] : memref<32xf32, #tpu.memory_space<smem>>
    %116 = vector.broadcast %115 : f32 to vector<1x128xf32>
    %117 = arith.mulf %1, %116 : vector<1x128xf32>
    %c15 = arith.constant 15 : index
    %118 = memref.load %arg2[%c15] : memref<32xf32, #tpu.memory_space<smem>>
    %119 = vector.broadcast %118 : f32 to vector<1x128xf32>
    %120 = arith.mulf %3, %119 : vector<1x128xf32>
    %121 = arith.addf %117, %120 : vector<1x128xf32>
    %c7_26 = arith.constant 7 : index
    %122 = memref.load %arg3[%c7_26] : memref<16xf32, #tpu.memory_space<smem>>
    %123 = vector.broadcast %122 : f32 to vector<1x128xf32>
    %124 = arith.addf %121, %123 : vector<1x128xf32>
    %cst_27 = arith.constant 0.000000e+00 : f32
    %125 = vector.broadcast %cst_27 : f32 to vector<1x128xf32>
    %126 = arith.maximumf %124, %125 : vector<1x128xf32>
    %c7_28 = arith.constant 7 : index
    %127 = memref.load %arg4[%c7_28] : memref<16xf32, #tpu.memory_space<smem>>
    %128 = vector.broadcast %127 : f32 to vector<1x128xf32>
    %129 = arith.mulf %126, %128 : vector<1x128xf32>
    %130 = arith.addf %114, %129 : vector<1x128xf32>
    %c16 = arith.constant 16 : index
    %131 = memref.load %arg2[%c16] : memref<32xf32, #tpu.memory_space<smem>>
    %132 = vector.broadcast %131 : f32 to vector<1x128xf32>
    %133 = arith.mulf %1, %132 : vector<1x128xf32>
    %c17 = arith.constant 17 : index
    %134 = memref.load %arg2[%c17] : memref<32xf32, #tpu.memory_space<smem>>
    %135 = vector.broadcast %134 : f32 to vector<1x128xf32>
    %136 = arith.mulf %3, %135 : vector<1x128xf32>
    %137 = arith.addf %133, %136 : vector<1x128xf32>
    %c8_29 = arith.constant 8 : index
    %138 = memref.load %arg3[%c8_29] : memref<16xf32, #tpu.memory_space<smem>>
    %139 = vector.broadcast %138 : f32 to vector<1x128xf32>
    %140 = arith.addf %137, %139 : vector<1x128xf32>
    %cst_30 = arith.constant 0.000000e+00 : f32
    %141 = vector.broadcast %cst_30 : f32 to vector<1x128xf32>
    %142 = arith.maximumf %140, %141 : vector<1x128xf32>
    %c8_31 = arith.constant 8 : index
    %143 = memref.load %arg4[%c8_31] : memref<16xf32, #tpu.memory_space<smem>>
    %144 = vector.broadcast %143 : f32 to vector<1x128xf32>
    %145 = arith.mulf %142, %144 : vector<1x128xf32>
    %146 = arith.addf %130, %145 : vector<1x128xf32>
    %c18 = arith.constant 18 : index
    %147 = memref.load %arg2[%c18] : memref<32xf32, #tpu.memory_space<smem>>
    %148 = vector.broadcast %147 : f32 to vector<1x128xf32>
    %149 = arith.mulf %1, %148 : vector<1x128xf32>
    %c19 = arith.constant 19 : index
    %150 = memref.load %arg2[%c19] : memref<32xf32, #tpu.memory_space<smem>>
    %151 = vector.broadcast %150 : f32 to vector<1x128xf32>
    %152 = arith.mulf %3, %151 : vector<1x128xf32>
    %153 = arith.addf %149, %152 : vector<1x128xf32>
    %c9_32 = arith.constant 9 : index
    %154 = memref.load %arg3[%c9_32] : memref<16xf32, #tpu.memory_space<smem>>
    %155 = vector.broadcast %154 : f32 to vector<1x128xf32>
    %156 = arith.addf %153, %155 : vector<1x128xf32>
    %cst_33 = arith.constant 0.000000e+00 : f32
    %157 = vector.broadcast %cst_33 : f32 to vector<1x128xf32>
    %158 = arith.maximumf %156, %157 : vector<1x128xf32>
    %c9_34 = arith.constant 9 : index
    %159 = memref.load %arg4[%c9_34] : memref<16xf32, #tpu.memory_space<smem>>
    %160 = vector.broadcast %159 : f32 to vector<1x128xf32>
    %161 = arith.mulf %158, %160 : vector<1x128xf32>
    %162 = arith.addf %146, %161 : vector<1x128xf32>
    %c20 = arith.constant 20 : index
    %163 = memref.load %arg2[%c20] : memref<32xf32, #tpu.memory_space<smem>>
    %164 = vector.broadcast %163 : f32 to vector<1x128xf32>
    %165 = arith.mulf %1, %164 : vector<1x128xf32>
    %c21 = arith.constant 21 : index
    %166 = memref.load %arg2[%c21] : memref<32xf32, #tpu.memory_space<smem>>
    %167 = vector.broadcast %166 : f32 to vector<1x128xf32>
    %168 = arith.mulf %3, %167 : vector<1x128xf32>
    %169 = arith.addf %165, %168 : vector<1x128xf32>
    %c10_35 = arith.constant 10 : index
    %170 = memref.load %arg3[%c10_35] : memref<16xf32, #tpu.memory_space<smem>>
    %171 = vector.broadcast %170 : f32 to vector<1x128xf32>
    %172 = arith.addf %169, %171 : vector<1x128xf32>
    %cst_36 = arith.constant 0.000000e+00 : f32
    %173 = vector.broadcast %cst_36 : f32 to vector<1x128xf32>
    %174 = arith.maximumf %172, %173 : vector<1x128xf32>
    %c10_37 = arith.constant 10 : index
    %175 = memref.load %arg4[%c10_37] : memref<16xf32, #tpu.memory_space<smem>>
    %176 = vector.broadcast %175 : f32 to vector<1x128xf32>
    %177 = arith.mulf %174, %176 : vector<1x128xf32>
    %178 = arith.addf %162, %177 : vector<1x128xf32>
    %c22 = arith.constant 22 : index
    %179 = memref.load %arg2[%c22] : memref<32xf32, #tpu.memory_space<smem>>
    %180 = vector.broadcast %179 : f32 to vector<1x128xf32>
    %181 = arith.mulf %1, %180 : vector<1x128xf32>
    %c23 = arith.constant 23 : index
    %182 = memref.load %arg2[%c23] : memref<32xf32, #tpu.memory_space<smem>>
    %183 = vector.broadcast %182 : f32 to vector<1x128xf32>
    %184 = arith.mulf %3, %183 : vector<1x128xf32>
    %185 = arith.addf %181, %184 : vector<1x128xf32>
    %c11_38 = arith.constant 11 : index
    %186 = memref.load %arg3[%c11_38] : memref<16xf32, #tpu.memory_space<smem>>
    %187 = vector.broadcast %186 : f32 to vector<1x128xf32>
    %188 = arith.addf %185, %187 : vector<1x128xf32>
    %cst_39 = arith.constant 0.000000e+00 : f32
    %189 = vector.broadcast %cst_39 : f32 to vector<1x128xf32>
    %190 = arith.maximumf %188, %189 : vector<1x128xf32>
    %c11_40 = arith.constant 11 : index
    %191 = memref.load %arg4[%c11_40] : memref<16xf32, #tpu.memory_space<smem>>
    %192 = vector.broadcast %191 : f32 to vector<1x128xf32>
    %193 = arith.mulf %190, %192 : vector<1x128xf32>
    %194 = arith.addf %178, %193 : vector<1x128xf32>
    %c24 = arith.constant 24 : index
    %195 = memref.load %arg2[%c24] : memref<32xf32, #tpu.memory_space<smem>>
    %196 = vector.broadcast %195 : f32 to vector<1x128xf32>
    %197 = arith.mulf %1, %196 : vector<1x128xf32>
    %c25 = arith.constant 25 : index
    %198 = memref.load %arg2[%c25] : memref<32xf32, #tpu.memory_space<smem>>
    %199 = vector.broadcast %198 : f32 to vector<1x128xf32>
    %200 = arith.mulf %3, %199 : vector<1x128xf32>
    %201 = arith.addf %197, %200 : vector<1x128xf32>
    %c12_41 = arith.constant 12 : index
    %202 = memref.load %arg3[%c12_41] : memref<16xf32, #tpu.memory_space<smem>>
    %203 = vector.broadcast %202 : f32 to vector<1x128xf32>
    %204 = arith.addf %201, %203 : vector<1x128xf32>
    %cst_42 = arith.constant 0.000000e+00 : f32
    %205 = vector.broadcast %cst_42 : f32 to vector<1x128xf32>
    %206 = arith.maximumf %204, %205 : vector<1x128xf32>
    %c12_43 = arith.constant 12 : index
    %207 = memref.load %arg4[%c12_43] : memref<16xf32, #tpu.memory_space<smem>>
    %208 = vector.broadcast %207 : f32 to vector<1x128xf32>
    %209 = arith.mulf %206, %208 : vector<1x128xf32>
    %210 = arith.addf %194, %209 : vector<1x128xf32>
    %c26 = arith.constant 26 : index
    %211 = memref.load %arg2[%c26] : memref<32xf32, #tpu.memory_space<smem>>
    %212 = vector.broadcast %211 : f32 to vector<1x128xf32>
    %213 = arith.mulf %1, %212 : vector<1x128xf32>
    %c27 = arith.constant 27 : index
    %214 = memref.load %arg2[%c27] : memref<32xf32, #tpu.memory_space<smem>>
    %215 = vector.broadcast %214 : f32 to vector<1x128xf32>
    %216 = arith.mulf %3, %215 : vector<1x128xf32>
    %217 = arith.addf %213, %216 : vector<1x128xf32>
    %c13_44 = arith.constant 13 : index
    %218 = memref.load %arg3[%c13_44] : memref<16xf32, #tpu.memory_space<smem>>
    %219 = vector.broadcast %218 : f32 to vector<1x128xf32>
    %220 = arith.addf %217, %219 : vector<1x128xf32>
    %cst_45 = arith.constant 0.000000e+00 : f32
    %221 = vector.broadcast %cst_45 : f32 to vector<1x128xf32>
    %222 = arith.maximumf %220, %221 : vector<1x128xf32>
    %c13_46 = arith.constant 13 : index
    %223 = memref.load %arg4[%c13_46] : memref<16xf32, #tpu.memory_space<smem>>
    %224 = vector.broadcast %223 : f32 to vector<1x128xf32>
    %225 = arith.mulf %222, %224 : vector<1x128xf32>
    %226 = arith.addf %210, %225 : vector<1x128xf32>
    %c28 = arith.constant 28 : index
    %227 = memref.load %arg2[%c28] : memref<32xf32, #tpu.memory_space<smem>>
    %228 = vector.broadcast %227 : f32 to vector<1x128xf32>
    %229 = arith.mulf %1, %228 : vector<1x128xf32>
    %c29 = arith.constant 29 : index
    %230 = memref.load %arg2[%c29] : memref<32xf32, #tpu.memory_space<smem>>
    %231 = vector.broadcast %230 : f32 to vector<1x128xf32>
    %232 = arith.mulf %3, %231 : vector<1x128xf32>
    %233 = arith.addf %229, %232 : vector<1x128xf32>
    %c14_47 = arith.constant 14 : index
    %234 = memref.load %arg3[%c14_47] : memref<16xf32, #tpu.memory_space<smem>>
    %235 = vector.broadcast %234 : f32 to vector<1x128xf32>
    %236 = arith.addf %233, %235 : vector<1x128xf32>
    %cst_48 = arith.constant 0.000000e+00 : f32
    %237 = vector.broadcast %cst_48 : f32 to vector<1x128xf32>
    %238 = arith.maximumf %236, %237 : vector<1x128xf32>
    %c14_49 = arith.constant 14 : index
    %239 = memref.load %arg4[%c14_49] : memref<16xf32, #tpu.memory_space<smem>>
    %240 = vector.broadcast %239 : f32 to vector<1x128xf32>
    %241 = arith.mulf %238, %240 : vector<1x128xf32>
    %242 = arith.addf %226, %241 : vector<1x128xf32>
    %c30 = arith.constant 30 : index
    %243 = memref.load %arg2[%c30] : memref<32xf32, #tpu.memory_space<smem>>
    %244 = vector.broadcast %243 : f32 to vector<1x128xf32>
    %245 = arith.mulf %1, %244 : vector<1x128xf32>
    %c31 = arith.constant 31 : index
    %246 = memref.load %arg2[%c31] : memref<32xf32, #tpu.memory_space<smem>>
    %247 = vector.broadcast %246 : f32 to vector<1x128xf32>
    %248 = arith.mulf %3, %247 : vector<1x128xf32>
    %249 = arith.addf %245, %248 : vector<1x128xf32>
    %c15_50 = arith.constant 15 : index
    %250 = memref.load %arg3[%c15_50] : memref<16xf32, #tpu.memory_space<smem>>
    %251 = vector.broadcast %250 : f32 to vector<1x128xf32>
    %252 = arith.addf %249, %251 : vector<1x128xf32>
    %cst_51 = arith.constant 0.000000e+00 : f32
    %253 = vector.broadcast %cst_51 : f32 to vector<1x128xf32>
    %254 = arith.maximumf %252, %253 : vector<1x128xf32>
    %c15_52 = arith.constant 15 : index
    %255 = memref.load %arg4[%c15_52] : memref<16xf32, #tpu.memory_space<smem>>
    %256 = vector.broadcast %255 : f32 to vector<1x128xf32>
    %257 = arith.mulf %254, %256 : vector<1x128xf32>
    %258 = arith.addf %242, %257 : vector<1x128xf32>
    %c0_53 = arith.constant 0 : index
    %259 = memref.load %arg5[%c0_53] : memref<1xf32, #tpu.memory_space<smem>>
    %260 = vector.broadcast %259 : f32 to vector<1x128xf32>
    %261 = arith.addf %258, %260 : vector<1x128xf32>
    %cst_54 = arith.constant 0.000000e+00 : f32
    %262 = vector.broadcast %cst_54 : f32 to vector<1x128xf32>
    %263 = arith.subf %262, %261 : vector<1x128xf32>
    %264 = math.exp %263 : vector<1x128xf32>
    %cst_55 = arith.constant 1.000000e+00 : f32
    %265 = vector.broadcast %cst_55 : f32 to vector<1x128xf32>
    %266 = arith.addf %265, %264 : vector<1x128xf32>
    %cst_56 = arith.constant 1.000000e+00 : f32
    %267 = vector.broadcast %cst_56 : f32 to vector<1x128xf32>
    %268 = arith.divf %267, %266 : vector<1x128xf32>
    %c0_57 = arith.constant 0 : index
    %c0_58 = arith.constant 0 : index
    %269 = vector.load %arg6[%c0_57, %c0_58] : memref<1x128xf32, #tpu.memory_space<vmem>>, vector<1x128xf32>
    tpu.vector_store %arg6[%c0_57, %c0_58], %268 {strides = array<i32>} : memref<1x128xf32, #tpu.memory_space<vmem>>, vector<1x128xf32>,
    return
  }
  func.func @transform_0(%arg0: i32) -> (i32, i32, i32) {
    %c0_i32 = arith.constant 0 : i32
    %c0_i32_0 = arith.constant 0 : i32
    %c0_i32_1 = arith.constant 0 : i32
    return %c0_i32, %arg0, %c0_i32_0 : i32, i32, i32
  }
  func.func @transform_1(%arg0: i32) -> i32 {
    %c0_i32 = arith.constant 0 : i32
    %c0_i32_0 = arith.constant 0 : i32
    return %c0_i32 : i32
  }
  func.func @transform_2(%arg0: i32) -> i32 {
    %c0_i32 = arith.constant 0 : i32
    %c0_i32_0 = arith.constant 0 : i32
    return %c0_i32 : i32
  }
  func.func @transform_3(%arg0: i32) -> i32 {
    %c0_i32 = arith.constant 0 : i32
    %c0_i32_0 = arith.constant 0 : i32
    return %c0_i32 : i32
  }
  func.func @transform_4(%arg0: i32) -> i32 {
    %c0_i32 = arith.constant 0 : i32
    %c0_i32_0 = arith.constant 0 : i32
    return %c0_i32 : i32
  }
  func.func @transform_5(%arg0: i32) -> (i32, i32) {
    %c0_i32 = arith.constant 0 : i32
    %c0_i32_0 = arith.constant 0 : i32
    return %arg0, %c0_i32 : i32, i32
  }
}

</mosaic_0001>

<bundles_post_ra>
// kernel: scene_probability_forward.1
= control target key start
LH: loop header
LB: loop body
LE: loop exit
PB: predicated region body
PF: predicated region fallthrough
CT: control target
= control target key end

     0   :  { %11 = vsyncpa [#allocation4], 0  ;;  %s598_s0 = inlined_call_operand.vmem [shape: f32[2,1,128], index: 0, kind: input, shape index: {}]   ;;  %s599_s1 = inlined_call_operand.vmem [shape: f32[32], index: 1, kind: input, shape index: {}]   ;;  %s600_s2 = inlined_call_operand.vmem [shape: f32[16], index: 2, kind: input, shape index: {}]   ;;  %s601_s3 = inlined_call_operand.vmem [shape: f32[16], index: 3, kind: input, shape index: {}]   ;;  %s602_s4 = inlined_call_operand.<no memory space> [shape: f32[1], index: 4, kind: input, shape index: {}]   ;;  %s603_s5 = inlined_call_operand.vmem [shape: f32[1,128], index: 5, kind: output, shape index: {}]  }
   0x1   :  { %12 = vsyncpa [#allocation6], 0  ;;  %s31_s20 = sshll.u32 %s600_s2, 4  ;;  %s21_s23 = sshll.u32 %s599_s1, 4  ;;  %s32_s20 = int_to_ptr.vmem [resolvable:$true] %s31_s20  ;;  %s22_s23 = int_to_ptr.vmem [resolvable:$true] %s21_s23 }
   0x2   :  { %s384_s24 = scalar_lea.vmem %s32_s20, 16  ;;  %p389_p1 = scmp.lt.s32.totalorder %s32_s20, %s32_s20 }
   0x3   :  { %p385_p0 = scmp.ne.s32.totalorder %s32_s20, %s384_s24  ;;  %p390_p2 = scmp.lt.s32.totalorder %s384_s24, %s384_s24 }
   0x5   :  { %p391_p3 = por %p390_p2, %p389_p1 }
   0x7   :  { %p392_p4 = pnand %p391_p3, %p385_p0 }
   0x9   :  { %395 = shalt.err (!%p392_p4)
}
   0xa   :  { %s424_s25 = smov [#allocation5]   ;;  %s396_s26 = scalar_lea.vmem %s22_s23, 16 }
   0xb   :  { %34 = dma.vmem_to_smem %s32_s20, 16, %s424_s25, [#allocation6]  }
   0xc   :  { %p397_p5 = scmp.ne.s32.totalorder %s22_s23, %s396_s26  ;;  %p401_p6 = scmp.lt.s32.totalorder %s22_s23, %s22_s23 }
   0xd   :  { %p402_p7 = scmp.lt.s32.totalorder %s396_s26, %s396_s26 }
   0xf   :  { %p403_p8 = por %p402_p7, %p401_p6 }
  0x11   :  { %p404_p9 = pnand %p403_p8, %p397_p5 }
  0x13   :  { %407 = shalt.err (!%p404_p9)
}
  0x14   :  { %s425_s2 = smov [#allocation3]   ;;  %s41_s28 = sshll.u32 %s601_s3, 4  ;;  %s42_s28 = int_to_ptr.vmem [resolvable:$true] %s41_s28 }
  0x15   :  { %24 = dma.vmem_to_smem %s22_s23, 16, %s425_s2, [#allocation4]  }
  0x16   :  { %s408_s29 = scalar_lea.vmem %s42_s28, 16  ;;  %p413_p11 = scmp.lt.s32.totalorder %s42_s28, %s42_s28 }
  0x17   :  { %p409_p10 = scmp.ne.s32.totalorder %s42_s28, %s408_s29  ;;  %p414_p12 = scmp.lt.s32.totalorder %s408_s29, %s408_s29 }
  0x19   :  { %p415_p13 = por %p414_p12, %p413_p11 }
  0x1b   :  { %p416_p0 = pnand %p415_p13, %p409_p10 }
  0x1d   :  { %419 = shalt.err (!%p416_p0)
}
  0x1e   :  { %s426_s30 = smov [#allocation7]  }
  0x1f   :  { %44 = dma.vmem_to_smem %s42_s28, 16, %s426_s30, [#allocation6]  }
  0x20   :  { %420 = dma.done.wait [#allocation4], 16  }
  0x21   :  { %421 = vsyncadd [#allocation4], 4294967280 }
  0x22   :  { %422 = dma.done.wait [#allocation6], 32  }
  0x23   :  { %423 = vsyncadd [#allocation6], 4294967264 }
  0x24   :  { %56 = sfence }
  0x25   :  { %s60_s6 = sld [smem:[#allocation3]]  ;;  %v471_v0 = vld [vmem:[%s598_s0] sm:$0x1]  ;;  %v476_v1 = vld [vmem:[%s598_s0 + $0x1] sm:$0x1] }
  0x26   :  { %s316_s7 = sld [smem:[#allocation3 + $0x1]] }
  0x27   :  { %s67_s8 = sld [smem:[#allocation5]] }
  0x28   :  { %s466_s9 = sld [smem:[#allocation7]] }
  0x29   :  { %s317_s11 = sld [smem:[#allocation3 + $0x2]] }
  0x2a   :  { %s318_s14 = sld [smem:[#allocation3 + $0x3]] }
  0x2b   :  { %v61_v2 = vstv %s60_s6  ;;  %s319_s15 = sld [smem:[#allocation5 + $0x1]] }
  0x2c   :  { %v62_v3 = vmul.f32 %v61_v2, %v471_v0  ;;  %v64_v4 = vstv %s316_s7  ;;  %s479_s16 = sld [smem:[#allocation7 + $0x1]] }
  0x2d   :  { %v65_v5 = vmul.f32 %v476_v1, %v64_v4  ;;  %s321_s17 = sld [smem:[#allocation3 + $0x4]]  ;;  %v68_v6 = vstv %s67_s8 }
  0x2e   :  { %s322_s18 = sld [smem:[#allocation3 + $0x5]]  ;;  %v72_v17 = vstv %s466_s9 }
  0x2f   :  { %v66_v7 = vadd.f32 %v65_v5, %v62_v3  ;;  %v75_v8 = vstv %s317_s11  ;;  %s482_s19 = sld [smem:[#allocation5 + $0x2]] }
  0x30   :  { %v76_v9 = vmul.f32 %v75_v8, %v471_v0  ;;  %v78_v10 = vstv %s318_s14  ;;  %s485_s0 = sld [smem:[#allocation7 + $0x2]] }
  0x31   :  { %v69_v11 = vadd.f32 %v68_v6, %v66_v7  ;;  %v79_v12 = vmul.f32 %v476_v1, %v78_v10  ;;  %s325_s20 = sld [smem:[#allocation3 + $0x6]]  ;;  %v82_v13 = vstv %s319_s15 }
  0x32   :  { %s326_s21 = sld [smem:[#allocation3 + $0x7]]  ;;  %v86_v22 = vstv %s479_s16 }
  0x33   :  { %v70_v14 = vmax.f32 %v69_v11, 0.0  ;;  %v80_v15 = vadd.f32 %v79_v12, %v76_v9  ;;  %v90_v16 = vstv %s321_s17  ;;  %s488_s22 = sld [smem:[#allocation5 + $0x3]] }
  0x34   :  { %v91_v18 = vmul.f32 %v90_v16, %v471_v0  ;;  %v93_v19 = vstv %s322_s18  ;;  %s492_s23 = sld [smem:[#allocation7 + $0x3]] }
  0x35   :  { %v83_v20 = vadd.f32 %v82_v13, %v80_v15  ;;  %v94_v21 = vmul.f32 %v476_v1, %v93_v19  ;;  %s329_s24 = sld [smem:[#allocation3 + $0x8]]  ;;  %v97_v23 = vstv %s482_s19  ;;  %v73_v24 = vmul.f32 %v72_v17, %v70_v14 }
  0x36   :  { %s330_s25 = sld [smem:[#allocation3 + $0x9]]  ;;  %v101_v33 = vstv %s485_s0 }
  0x37   :  { %v84_v25 = vmax.f32 %v83_v20, 0.0  ;;  %v95_v26 = vadd.f32 %v94_v21, %v91_v18  ;;  %v105_v27 = vstv %s325_s20  ;;  %s497_s26 = sld [smem:[#allocation5 + $0x4]] }
  0x38   :  { %v106_v28 = vmul.f32 %v105_v27, %v471_v0  ;;  %v108_v29 = vstv %s326_s21  ;;  %s500_s2 = sld [smem:[#allocation7 + $0x4]] }
  0x39   :  { %v87_v30 = vmul.f32 %v86_v22, %v84_v25  ;;  %v98_v31 = vadd.f32 %v97_v23, %v95_v26  ;;  %v109_v32 = vmul.f32 %v476_v1, %v108_v29  ;;  %s333_s1 = sld [smem:[#allocation3 + $0xa]]  ;;  %v112_v34 = vstv %s488_s22 }
  0x3a   :  { %s334_s27 = sld [smem:[#allocation3 + $0xb]]  ;;  %v116_v44 = vstv %s492_s23 }
  0x3b   :  { %v88_v35 = vadd.f32 %v87_v30, %v73_v24  ;;  %v99_v36 = vmax.f32 %v98_v31, 0.0  ;;  %v110_v37 = vadd.f32 %v109_v32, %v106_v28  ;;  %v120_v38 = vstv %s329_s24  ;;  %s505_s28 = sld [smem:[#allocation5 + $0x5]] }
  0x3c   :  { %v121_v39 = vmul.f32 %v120_v38, %v471_v0  ;;  %v123_v40 = vstv %s330_s25  ;;  %s508_s29 = sld [smem:[#allocation7 + $0x5]] }
  0x3d   :  { %v102_v41 = vmul.f32 %v101_v33, %v99_v36  ;;  %v113_v42 = vadd.f32 %v112_v34, %v110_v37  ;;  %v124_v43 = vmul.f32 %v476_v1, %v123_v40  ;;  %s337_s30 = sld [smem:[#allocation3 + $0xc]]  ;;  %v127_v45 = vstv %s497_s26 }
  0x3e   :  { %s338_s6 = sld [smem:[#allocation3 + $0xd]]  ;;  %v131_v55 = vstv %s500_s2 }
  0x3f   :  { %v103_v46 = vadd.f32 %v102_v41, %v88_v35  ;;  %v114_v47 = vmax.f32 %v113_v42, 0.0  ;;  %v125_v48 = vadd.f32 %v124_v43, %v121_v39  ;;  %v135_v49 = vstv %s333_s1  ;;  %s513_s7 = sld [smem:[#allocation5 + $0x6]] }
  0x40   :  { %v136_v50 = vmul.f32 %v135_v49, %v471_v0  ;;  %v138_v51 = vstv %s334_s27  ;;  %s516_s8 = sld [smem:[#allocation7 + $0x6]] }
  0x41   :  { %v117_v52 = vmul.f32 %v116_v44, %v114_v47  ;;  %v128_v53 = vadd.f32 %v127_v45, %v125_v48  ;;  %v139_v54 = vmul.f32 %v476_v1, %v138_v51  ;;  %s341_s9 = sld [smem:[#allocation3 + $0xe]]  ;;  %v142_v56 = vstv %s505_s28 }
  0x42   :  { %s342_s3 = sld [smem:[#allocation3 + $0xf]]  ;;  %v146_v4 = vstv %s508_s29 }
  0x43   :  { %v118_v57 = vadd.f32 %v117_v52, %v103_v46  ;;  %v129_v58 = vmax.f32 %v128_v53, 0.0  ;;  %v140_v59 = vadd.f32 %v139_v54, %v136_v50  ;;  %v150_v60 = vstv %s337_s30  ;;  %s521_s10 = sld [smem:[#allocation5 + $0x7]] }
  0x44   :  { %v151_v61 = vmul.f32 %v150_v60, %v471_v0  ;;  %v153_v62 = vstv %s338_s6  ;;  %s524_s11 = sld [smem:[#allocation7 + $0x7]] }
  0x45   :  { %v132_v63 = vmul.f32 %v131_v55, %v129_v58  ;;  %v143_v2 = vadd.f32 %v142_v56, %v140_v59  ;;  %v154_v3 = vmul.f32 %v476_v1, %v153_v62  ;;  %s345_s12 = sld [smem:[#allocation3 + $0x10]]  ;;  %v157_v5 = vstv %s513_s7 }
  0x46   :  { %s346_s13 = sld [smem:[#allocation3 + $0x11]]  ;;  %v161_v15 = vstv %s516_s8 }
  0x47   :  { %v133_v6 = vadd.f32 %v132_v63, %v118_v57  ;;  %v144_v7 = vmax.f32 %v143_v2, 0.0  ;;  %v155_v8 = vadd.f32 %v154_v3, %v151_v61  ;;  %v165_v9 = vstv %s341_s9  ;;  %s529_s14 = sld [smem:[#allocation5 + $0x8]] }
  0x48   :  { %v166_v10 = vmul.f32 %v165_v9, %v471_v0  ;;  %v168_v11 = vstv %s342_s3  ;;  %s532_s15 = sld [smem:[#allocation7 + $0x8]] }
  0x49   :  { %v147_v12 = vmul.f32 %v146_v4, %v144_v7  ;;  %v158_v13 = vadd.f32 %v157_v5, %v155_v8  ;;  %v169_v14 = vmul.f32 %v476_v1, %v168_v11  ;;  %s349_s16 = sld [smem:[#allocation3 + $0x12]]  ;;  %v172_v16 = vstv %s521_s10 }
  0x4a   :  { %s350_s17 = sld [smem:[#allocation3 + $0x13]]  ;;  %v176_v26 = vstv %s524_s11 }
  0x4b   :  { %v148_v17 = vadd.f32 %v147_v12, %v133_v6  ;;  %v159_v18 = vmax.f32 %v158_v13, 0.0  ;;  %v170_v19 = vadd.f32 %v169_v14, %v166_v10  ;;  %v180_v20 = vstv %s345_s12  ;;  %s537_s18 = sld [smem:[#allocation5 + $0x9]] }
  0x4c   :  { %v181_v21 = vmul.f32 %v180_v20, %v471_v0  ;;  %v183_v22 = vstv %s346_s13  ;;  %s540_s19 = sld [smem:[#allocation7 + $0x9]] }
  0x4d   :  { %v162_v23 = vmul.f32 %v161_v15, %v159_v18  ;;  %v173_v24 = vadd.f32 %v172_v16, %v170_v19  ;;  %v184_v25 = vmul.f32 %v476_v1, %v183_v22  ;;  %s353_s0 = sld [smem:[#allocation3 + $0x14]]  ;;  %v187_v27 = vstv %s529_s14 }
  0x4e   :  { %s354_s20 = sld [smem:[#allocation3 + $0x15]]  ;;  %v191_v37 = vstv %s532_s15 }
  0x4f   :  { %v163_v28 = vadd.f32 %v162_v23, %v148_v17  ;;  %v174_v29 = vmax.f32 %v173_v24, 0.0  ;;  %v185_v30 = vadd.f32 %v184_v25, %v181_v21  ;;  %v195_v31 = vstv %s349_s16  ;;  %s545_s21 = sld [smem:[#allocation5 + $0xa]] }
  0x50   :  { %v196_v32 = vmul.f32 %v195_v31, %v471_v0  ;;  %v198_v33 = vstv %s350_s17  ;;  %s548_s22 = sld [smem:[#allocation7 + $0xa]] }
  0x51   :  { %v177_v34 = vmul.f32 %v176_v26, %v174_v29  ;;  %v188_v35 = vadd.f32 %v187_v27, %v185_v30  ;;  %v199_v36 = vmul.f32 %v476_v1, %v198_v33  ;;  %s357_s23 = sld [smem:[#allocation3 + $0x16]]  ;;  %v202_v38 = vstv %s537_s18 }
  0x52   :  { %s358_s24 = sld [smem:[#allocation3 + $0x17]]  ;;  %v206_v48 = vstv %s540_s19 }
  0x53   :  { %v178_v39 = vadd.f32 %v177_v34, %v163_v28  ;;  %v189_v40 = vmax.f32 %v188_v35, 0.0  ;;  %v200_v41 = vadd.f32 %v199_v36, %v196_v32  ;;  %v210_v42 = vstv %s353_s0  ;;  %s553_s25 = sld [smem:[#allocation5 + $0xb]] }
  0x54   :  { %v211_v43 = vmul.f32 %v210_v42, %v471_v0  ;;  %v213_v44 = vstv %s354_s20  ;;  %s556_s26 = sld [smem:[#allocation7 + $0xb]] }
  0x55   :  { %v192_v45 = vmul.f32 %v191_v37, %v189_v40  ;;  %v203_v46 = vadd.f32 %v202_v38, %v200_v41  ;;  %v214_v47 = vmul.f32 %v476_v1, %v213_v44  ;;  %s361_s2 = sld [smem:[#allocation3 + $0x18]]  ;;  %v217_v49 = vstv %s545_s21 }
  0x56   :  { %s362_s1 = sld [smem:[#allocation3 + $0x19]]  ;;  %v221_v59 = vstv %s548_s22 }
  0x57   :  { %v193_v50 = vadd.f32 %v192_v45, %v178_v39  ;;  %v204_v51 = vmax.f32 %v203_v46, 0.0  ;;  %v215_v52 = vadd.f32 %v214_v47, %v211_v43  ;;  %v225_v53 = vstv %s357_s23  ;;  %s561_s27 = sld [smem:[#allocation5 + $0xc]] }
  0x58   :  { %v226_v54 = vmul.f32 %v225_v53, %v471_v0  ;;  %v228_v55 = vstv %s358_s24  ;;  %s564_s28 = sld [smem:[#allocation7 + $0xc]] }
  0x59   :  { %v207_v56 = vmul.f32 %v206_v48, %v204_v51  ;;  %v218_v57 = vadd.f32 %v217_v49, %v215_v52  ;;  %v229_v58 = vmul.f32 %v476_v1, %v228_v55  ;;  %s365_s29 = sld [smem:[#allocation3 + $0x1a]]  ;;  %v232_v60 = vstv %s553_s25 }
  0x5a   :  { %s366_s30 = sld [smem:[#allocation3 + $0x1b]]  ;;  %v236_v8 = vstv %s556_s26 }
  0x5b   :  { %v208_v61 = vadd.f32 %v207_v56, %v193_v50  ;;  %v219_v62 = vmax.f32 %v218_v57, 0.0  ;;  %v230_v63 = vadd.f32 %v229_v58, %v226_v54  ;;  %v240_v2 = vstv %s361_s2  ;;  %s569_s6 = sld [smem:[#allocation5 + $0xd]] }
  0x5c   :  { %v241_v3 = vmul.f32 %v240_v2, %v471_v0  ;;  %v243_v4 = vstv %s362_s1  ;;  %s572_s7 = sld [smem:[#allocation7 + $0xd]] }
  0x5d   :  { %v222_v5 = vmul.f32 %v221_v59, %v219_v62  ;;  %v233_v6 = vadd.f32 %v232_v60, %v230_v63  ;;  %v244_v7 = vmul.f32 %v476_v1, %v243_v4  ;;  %s369_s8 = sld [smem:[#allocation3 + $0x1c]]  ;;  %v247_v9 = vstv %s561_s27 }
  0x5e   :  { %s370_s9 = sld [smem:[#allocation3 + $0x1d]]  ;;  %v251_v19 = vstv %s564_s28 }
  0x5f   :  { %v223_v10 = vadd.f32 %v222_v5, %v208_v61  ;;  %v234_v11 = vmax.f32 %v233_v6, 0.0  ;;  %v245_v12 = vadd.f32 %v244_v7, %v241_v3  ;;  %v255_v13 = vstv %s365_s29  ;;  %s577_s3 = sld [smem:[#allocation5 + $0xe]] }
  0x60   :  { %v256_v14 = vmul.f32 %v255_v13, %v471_v0  ;;  %v258_v15 = vstv %s366_s30  ;;  %s580_s10 = sld [smem:[#allocation7 + $0xe]] }
  0x61   :  { %v237_v16 = vmul.f32 %v236_v8, %v234_v11  ;;  %v248_v17 = vadd.f32 %v247_v9, %v245_v12  ;;  %v259_v18 = vmul.f32 %v476_v1, %v258_v15  ;;  %s373_s11 = sld [smem:[#allocation3 + $0x1e]]  ;;  %v262_v20 = vstv %s569_s6 }
  0x62   :  { %s374_s12 = sld [smem:[#allocation3 + $0x1f]]  ;;  %v266_v30 = vstv %s572_s7 }
  0x63   :  { %v238_v21 = vadd.f32 %v237_v16, %v223_v10  ;;  %v249_v22 = vmax.f32 %v248_v17, 0.0  ;;  %v260_v23 = vadd.f32 %v259_v18, %v256_v14  ;;  %v270_v24 = vstv %s369_s8  ;;  %s375_s13 = sld [smem:[#allocation5 + $0xf]] }
  0x64   :  { %v271_v25 = vmul.f32 %v270_v24, %v471_v0  ;;  %v273_v26 = vstv %s370_s9  ;;  %s376_s14 = sld [smem:[#allocation7 + $0xf]] }
  0x65   :  { %v252_v27 = vmul.f32 %v251_v19, %v249_v22  ;;  %v263_v28 = vadd.f32 %v262_v20, %v260_v23  ;;  %v274_v29 = vmul.f32 %v476_v1, %v273_v26  ;;  %v277_v31 = vstv %s577_s3 }
  0x66   :  { %v281_v41 = vstv %s580_s10 }
  0x67   :  { %v253_v32 = vadd.f32 %v252_v27, %v238_v21  ;;  %v264_v33 = vmax.f32 %v263_v28, 0.0  ;;  %v275_v34 = vadd.f32 %v274_v29, %v271_v25  ;;  %v285_v35 = vstv %s373_s11 }
  0x68   :  { %v286_v36 = vmul.f32 %v285_v35, %v471_v0  ;;  %v288_v37 = vstv %s374_s12  ;;  %v300_v0 = vstv %s602_s4 }
  0x69   :  { %v267_v38 = vmul.f32 %v266_v30, %v264_v33  ;;  %v278_v39 = vadd.f32 %v277_v31, %v275_v34  ;;  %v289_v40 = vmul.f32 %v476_v1, %v288_v37  ;;  %v292_v42 = vstv %s375_s13 }
  0x6a   :  { %v296_v48 = vstv %s376_s14 }
  0x6b   :  { %v268_v43 = vadd.f32 %v267_v38, %v253_v32  ;;  %v279_v44 = vmax.f32 %v278_v39, 0.0  ;;  %v290_v45 = vadd.f32 %v289_v40, %v286_v36 }
  0x6d   :  { %v282_v46 = vmul.f32 %v281_v41, %v279_v44  ;;  %v293_v47 = vadd.f32 %v292_v42, %v290_v45 }
  0x6f   :  { %v283_v49 = vadd.f32 %v282_v46, %v268_v43  ;;  %v294_v50 = vmax.f32 %v293_v47, 0.0 }
  0x71   :  { %v297_v51 = vmul.f32 %v296_v48, %v294_v50 }
  0x73   :  { %v298_v52 = vadd.f32 %v297_v51, %v283_v49 }
  0x75   :  { %v301_v53 = vadd.f32 %v300_v0, %v298_v52 }
  0x77   :  { %v302_v54 = vsub.f32 0.0, %v301_v53 }
  0x79   :  { %v303_v55 = vmul.f32 1.442695, %v302_v54 }
  0x7b   :  { %380 = vpow2.f32 %v303_v55 }
  0x88   :  { %v381_v1 = vpop.eup %380 }
  0x89   :  { %v305_v56 = vadd.f32 1.0, %v381_v1 }
  0x8b   :  { %382 = vrcp.f32 %v305_v56 }
  0x98   :  { %v383_v57 = vpop.eup %382 }
  0x99   :  { %308 = vst [vmem:[%s603_s5] sm:$0x1] %v383_v57 }
  0x9a   :  { %313 = vsyncpa [#allocation4], 1 }
  0x9b   :  { %314 = vsyncpa [#allocation6], 1 }

</bundles_post_ra>
